<compile_context>
chip_gen: v7x
topology: tpu7x:2x2x1
jax: 0.10.0
libtpu: 0.0.40
codegen_flags: <defaults>
</compile_context>

<pallas_src>
import functools

import jax
import jax.numpy as jnp
from jax.experimental import pallas as pl
from jax.experimental.pallas import tpu as pltpu

_LANE = 128
_SUBLANE = 8

_TARGET_TILE_BYTES = 12 * 1024 * 1024   # per-step x tile (Pallas double-buffers it)
_FULL_L_BUDGET = 16 * 1024 * 1024       # if min-tB * (C, L) row slab fits, take tL = L
_MAX_TILE_L = 2048
_VMEM_CAP = 48 * 1024 * 1024            # safe on v5e/v6e (128 MiB) and v7x (64 MiB)


def _round_up(x, m):
    return ((x + m - 1) // m) * m


def _round_down(x, m):
    return (x // m) * m


def _channel_attention_kernel(x_ref, w1t_ref, w2t_ref, out_ref,
                              max_acc, sum_acc, *, L, tL, inv_L, needs_mask):
    l = pl.program_id(1)
    n_l = pl.num_programs(1)

    def fold(step_max, step_sum):
        @pl.when(l == 0)
        def _init():
            max_acc[...] = step_max
            sum_acc[...] = step_sum

        @pl.when(l > 0)
        def _accumulate():
            max_acc[...] = jnp.maximum(max_acc[...], step_max)
            sum_acc[...] = sum_acc[...] + step_sum

    x = x_ref[...]                                            # (tB, C, tL)

    if needs_mask:
        # Only the final (partial) L tile pays for the mask; steady state stays
        # a pure XLU reduce + VPU max/add, hidden under the DMA.
        @pl.when(l < n_l - 1)
        def _steady():
            fold(jnp.max(x, axis=-1).astype(jnp.float32),
                 jnp.sum(x.astype(jnp.float32), axis=-1))

        @pl.when(l == n_l - 1)
        def _tail():
            lane = jax.lax.broadcasted_iota(jnp.int32, x.shape, 2) + l * tL
            valid = lane < L
            # NOTE: -inf mask constant assumes a float dtype (f32/bf16).
            x_max = jnp.where(valid, x, jnp.array(-jnp.inf, dtype=x.dtype))
            x_sum = jnp.where(valid, x.astype(jnp.float32), 0.0)
            fold(jnp.max(x_max, axis=-1).astype(jnp.float32),
                 jnp.sum(x_sum, axis=-1))
    else:
        fold(jnp.max(x, axis=-1).astype(jnp.float32),
             jnp.sum(x.astype(jnp.float32), axis=-1))

    @pl.when(l == n_l - 1)
    def _finalize():
        max_pool = max_acc[...]                               # (tB, C) f32
        avg_pool = sum_acc[...] * inv_L                       # (tB, C) f32

        w1t = w1t_ref[...].astype(jnp.float32)                # (C, Crp)
        w2t = w2t_ref[...].astype(jnp.float32)                # (Crp, C)

        def se(v):  # (tB, C) -> (tB, C)
            h = jnp.dot(v, w1t, preferred_element_type=jnp.float32)
            h = jnp.maximum(h, 0.0)
            return jnp.dot(h, w2t, preferred_element_type=jnp.float32)

        # Padded rows of a partial final B block may flow garbage/NaN through
        # the -inf/sigmoid path; Pallas discards them on writeback (benign).
        out_ref[...] = jax.nn.sigmoid(se(max_pool) + se(avg_pool)).astype(out_ref.dtype)


def _choose_tiles(B, C, L, itemsize, target_tile_bytes, full_l_budget):
    row_bytes = C * L * itemsize                  # one (C, L) slab per batch row
    min_tb = B if B <= _SUBLANE else _SUBLANE

    if L < _LANE or min_tb * row_bytes <= full_l_budget:
        # Full-extent L block: fully contiguous DMA per (b, c) row, single L step.
        tL = L
        if B <= _SUBLANE:
            tB = B
        else:
            tB = _round_down(max(1, target_tile_bytes // max(1, row_bytes)), _SUBLANE)
            tB = max(_SUBLANE, min(tB, _round_down(B, _SUBLANE)))
    else:
        # One minimum B tile already exceeds the budget: stream L in
        # lane-aligned tiles (tail tile masked in-kernel if L % tL != 0).
        tB = min_tb
        max_tl = _round_down(target_tile_bytes // max(1, tB * C * itemsize), _LANE)
        tL = max(_LANE, min(_MAX_TILE_L, max_tl))
        tL = min(tL, _round_down(L, _LANE))       # L >= _LANE here

    # v7x megacore: keep >= 2 blocks on the 'parallel' B axis whenever possible
    # so both TensorCores get work (no effect on single-TC v5e/v6e).
    if B >= 2 * _SUBLANE:
        tB = min(tB, _round_up(pl.cdiv(B, 2), _SUBLANE))
    return tB, tL


def channel_attention(x, w1, w2, *,
                      target_tile_bytes=_TARGET_TILE_BYTES,
                      full_l_budget=_FULL_L_BUDGET):
    """CBAM ChannelAttention forward.

    x:  (B, C, L) float
    w1: (Cr, C)   first 1x1 Conv1d weight (kernel dim squeezed)
    w2: (C, Cr)   second 1x1 Conv1d weight
    returns (B, C, 1), matching the PyTorch module.
    """
    B, C, L = x.shape
    Cr = w1.shape[0]
    itemsize = x.dtype.itemsize

    # Pre-transpose weights (clean MXU feed path) and zero-pad the reduced
    # channel dim to a sublane multiple (mathematically neutral).
    Crp = max(_SUBLANE, _round_up(Cr, _SUBLANE))
    w1t = jnp.zeros((C, Crp), w1.dtype).at[:, :Cr].set(w1.T)    # (C, Crp)
    w2t = jnp.zeros((Crp, C), w2.dtype).at[:Cr, :].set(w2.T)    # (Crp, C)

    tB, tL = _choose_tiles(B, C, L, itemsize, target_tile_bytes, full_l_budget)
    grid = (pl.cdiv(B, tB), pl.cdiv(L, tL))
    needs_mask = (L % tL) != 0

    tile_bytes = tB * C * tL * itemsize
    acc_bytes = 2 * tB * C * 4                        # two tiny f32 accumulators
    weight_bytes = (C * Crp + Crp * C) * w1.dtype.itemsize
    out_bytes = tB * C * itemsize
    vmem_need = 2 * tile_bytes + acc_bytes + 2 * weight_bytes + 2 * out_bytes
    vmem_limit = int(min(_VMEM_CAP, max(vmem_need + (4 << 20), 16 << 20)))

    cost = pl.CostEstimate(
        flops=int(2 * B * C * L + 8 * B * C * Crp),
        transcendentals=int(B * C),
        bytes_accessed=int(B * C * L * itemsize + B * C * itemsize + weight_bytes),
    )

    kernel = functools.partial(
        _channel_attention_kernel,
        L=L, tL=tL, inv_L=1.0 / L, needs_mask=needs_mask)

    out = pl.pallas_call(
        kernel,
        out_shape=jax.ShapeDtypeStruct((B, C), x.dtype),
        grid=grid,
        in_specs=[
            # TODO(synk): optionally sweep pipeline_mode=pl.Buffered(3) on this
            # spec if a trace shows exposed DMA on strided reads (costs one
            # extra tile of VMEM).
            pl.BlockSpec((tB, C, tL), lambda b, l: (b, 0, l)),
            pl.BlockSpec((C, Crp), lambda b, l: (0, 0)),
            pl.BlockSpec((Crp, C), lambda b, l: (0, 0)),
        ],
        # Output block index is constant along the L (reduction) axis, so it
        # stays resident in VMEM and is written back once per B tile.
        out_specs=pl.BlockSpec((tB, C), lambda b, l: (b, 0)),
        scratch_shapes=[
            pltpu.VMEM((tB, C), jnp.float32),    # running max (lane-dense, tiny)
            pltpu.VMEM((tB, C), jnp.float32),    # running sum (f32)
        ],
        compiler_params=pltpu.CompilerParams(
            dimension_semantics=("parallel", "arbitrary"),
            vmem_limit_bytes=vmem_limit,
        ),
        cost_estimate=cost,
    )(x, w1t, w2t)

    # Lane-dense (B, C) inside the kernel; restore the (B, C, 1) PyTorch shape here.
    return out[..., None]


def reference(x, w1, w2):
    # Pure-JAX reference mirroring the PyTorch forward.
    max_pool = jnp.max(x, axis=-1)
    avg_pool = jnp.mean(x, axis=-1)

    def se(v):
        return jnp.maximum(v @ w1.T, 0.0) @ w2.T

    return jax.nn.sigmoid(se(max_pool) + se(avg_pool))[..., None]


if __name__ == "__main__":
    key = jax.random.PRNGKey(0)

    def run_case(B, C, L, reduction, **tiling_kw):
        Cr = max(C // reduction, 1)
        kx, k1, k2 = jax.random.split(jax.random.fold_in(key, B * 1000003 + L), 3)
        x = jax.random.normal(kx, (B, C, L), dtype=jnp.float32)
        # Conv1d weights have shape (out_ch, in_ch, 1); kernel dim squeezed here.
        w1 = jax.random.normal(k1, (Cr, C), dtype=jnp.float32) * 0.1
        w2 = jax.random.normal(k2, (C, Cr), dtype=jnp.float32) * 0.1

        out = jax.block_until_ready(channel_attention(x, w1, w2, **tiling_kw))
        ref = reference(x, w1, w2)
        assert out.shape == (B, C, 1)
        assert jnp.allclose(out, ref, atol=2e-5, rtol=2e-5), f"mismatch B={B} C={C} L={L}"

    # Module defaults (channel=32, reduction=16 -> Cr=2): full-extent-L fast path.
    run_case(B=2, C=32, L=16, reduction=16)
    # Streaming path with a partial (masked) tail L tile, forced at a small shape
    # by shrinking the tiling budgets (tL=128, 11 L steps, last one partial).
    run_case(B=2, C=32, L=1300, reduction=16,
             target_tile_bytes=8 * 1024, full_l_budget=4 * 1024)
    # Streaming path, lane-aligned L (no tail mask), multi-block "parallel" B axis
    # (B=20 -> tB=8 -> 3 B blocks, last one partial).
    run_case(B=20, C=32, L=1024, reduction=16,
             target_tile_bytes=64 * 1024, full_l_budget=32 * 1024)

    print("KERNEL_OK")
</pallas_src>

<mosaic_0001>
module attributes {stable_mosaic.version = 11 : i64} {
  func.func @_channel_attention_kernel(%arg0: i32, %arg1: i32, %arg2: memref<2x32x16xf32, #tpu.memory_space<vmem>>, %arg3: memref<32x8xf32, #tpu.memory_space<vmem>>, %arg4: memref<8x32xf32, #tpu.memory_space<vmem>>, %arg5: memref<2x32xf32, #tpu.memory_space<vmem>>, %arg6: memref<2x32xf32, #tpu.memory_space<vmem>>, %arg7: memref<2x32xf32, #tpu.memory_space<vmem>>) attributes {dimension_semantics = [#tpu.dimension_semantics<parallel>, #tpu.dimension_semantics<arbitrary>], iteration_bounds = array<i64: 1, 1>, scalar_prefetch = 0 : i64, scratch_operands = 2 : i64, tpu.core_type = #tpu.core_type<tc>, window_params = [{transform_indices = @transform_0, window_bounds = array<i64: 2, 32, 16>}, {pipeline_mode = #tpu.pipeline_mode<synchronous>, transform_indices = @transform_1, window_bounds = array<i64: 32, 8>}, {pipeline_mode = #tpu.pipeline_mode<synchronous>, transform_indices = @transform_2, window_bounds = array<i64: 8, 32>}, {transform_indices = @transform_3, window_bounds = array<i64: 2, 32>}]} {
    %c0 = arith.constant 0 : index
    %c0_0 = arith.constant 0 : index
    %c0_1 = arith.constant 0 : index
    %0 = vector.load %arg2[%c0, %c0_0, %c0_1] : memref<2x32x16xf32, #tpu.memory_space<vmem>>, vector<2x32x16xf32>
    %cst = arith.constant dense<0xFF800000> : vector<2x32xf32>
    %1 = vector.multi_reduction <maximumf>, %0, %cst [2] : vector<2x32x16xf32> to vector<2x32xf32>
    %cst_2 = arith.constant dense<0.000000e+00> : vector<2x32xf32>
    %2 = vector.multi_reduction <add>, %0, %cst_2 [2] : vector<2x32x16xf32> to vector<2x32xf32>
    %c0_i32 = arith.constant 0 : i32
    %3 = arith.cmpi eq, %arg1, %c0_i32 : i32
    %4 = arith.extui %3 : i1 to i32
    %c0_i32_3 = arith.constant 0 : i32
    %5 = arith.cmpi ne, %4, %c0_i32_3 : i32
    scf.if %5 {
      %c0_8 = arith.constant 0 : index
      %c0_9 = arith.constant 0 : index
      %12 = vector.load %arg6[%c0_8, %c0_9] : memref<2x32xf32, #tpu.memory_space<vmem>>, vector<2x32xf32>
      tpu.vector_store %arg6[%c0_8, %c0_9], %1 {strides = array<i32>} : memref<2x32xf32, #tpu.memory_space<vmem>>, vector<2x32xf32>,
      %c0_10 = arith.constant 0 : index
      %c0_11 = arith.constant 0 : index
      %13 = vector.load %arg7[%c0_10, %c0_11] : memref<2x32xf32, #tpu.memory_space<vmem>>, vector<2x32xf32>
      tpu.vector_store %arg7[%c0_10, %c0_11], %2 {strides = array<i32>} : memref<2x32xf32, #tpu.memory_space<vmem>>, vector<2x32xf32>,
    } else {
    }
    %c0_i32_4 = arith.constant 0 : i32
    %6 = arith.cmpi sgt, %arg1, %c0_i32_4 : i32
    %7 = arith.extui %6 : i1 to i32
    %c0_i32_5 = arith.constant 0 : i32
    %8 = arith.cmpi ne, %7, %c0_i32_5 : i32
    scf.if %8 {
      %c0_8 = arith.constant 0 : index
      %c0_9 = arith.constant 0 : index
      %12 = vector.load %arg6[%c0_8, %c0_9] : memref<2x32xf32, #tpu.memory_space<vmem>>, vector<2x32xf32>
      %13 = arith.maximumf %12, %1 : vector<2x32xf32>
      %c0_10 = arith.constant 0 : index
      %c0_11 = arith.constant 0 : index
      %14 = vector.load %arg6[%c0_10, %c0_11] : memref<2x32xf32, #tpu.memory_space<vmem>>, vector<2x32xf32>
      tpu.vector_store %arg6[%c0_10, %c0_11], %13 {strides = array<i32>} : memref<2x32xf32, #tpu.memory_space<vmem>>, vector<2x32xf32>,
      %c0_12 = arith.constant 0 : index
      %c0_13 = arith.constant 0 : index
      %15 = vector.load %arg7[%c0_12, %c0_13] : memref<2x32xf32, #tpu.memory_space<vmem>>, vector<2x32xf32>
      %16 = arith.addf %15, %2 : vector<2x32xf32>
      %c0_14 = arith.constant 0 : index
      %c0_15 = arith.constant 0 : index
      %17 = vector.load %arg7[%c0_14, %c0_15] : memref<2x32xf32, #tpu.memory_space<vmem>>, vector<2x32xf32>
      tpu.vector_store %arg7[%c0_14, %c0_15], %16 {strides = array<i32>} : memref<2x32xf32, #tpu.memory_space<vmem>>, vector<2x32xf32>,
    } else {
    }
    %c0_i32_6 = arith.constant 0 : i32
    %9 = arith.cmpi eq, %arg1, %c0_i32_6 : i32
    %10 = arith.extui %9 : i1 to i32
    %c0_i32_7 = arith.constant 0 : i32
    %11 = arith.cmpi ne, %10, %c0_i32_7 : i32
    scf.if %11 {
      %c0_8 = arith.constant 0 : index
      %c0_9 = arith.constant 0 : index
      %12 = vector.load %arg6[%c0_8, %c0_9] : memref<2x32xf32, #tpu.memory_space<vmem>>, vector<2x32xf32>
      %c0_10 = arith.constant 0 : index
      %c0_11 = arith.constant 0 : index
      %13 = vector.load %arg7[%c0_10, %c0_11] : memref<2x32xf32, #tpu.memory_space<vmem>>, vector<2x32xf32>
      %cst_12 = arith.constant 6.250000e-02 : f32
      %14 = vector.broadcast %cst_12 : f32 to vector<2x32xf32>
      %15 = arith.mulf %13, %14 : vector<2x32xf32>
      %c0_13 = arith.constant 0 : index
      %c0_14 = arith.constant 0 : index
      %16 = vector.load %arg3[%c0_13, %c0_14] : memref<32x8xf32, #tpu.memory_space<vmem>>, vector<32x8xf32>
      %c0_15 = arith.constant 0 : index
      %c0_16 = arith.constant 0 : index
      %17 = vector.load %arg4[%c0_15, %c0_16] : memref<8x32xf32, #tpu.memory_space<vmem>>, vector<8x32xf32>
      %cst_17 = arith.constant dense<0.000000e+00> : vector<2x8xf32>
      %18 = tpu.matmul %12, %16, %cst_17 {dimension_numbers = #tpu.dot_dimension_numbers<[1], [0], [0], [1], [0, 0, 1, 1], [], []>} : vector<2x32xf32>, vector<32x8xf32>, vector<2x8xf32> -> vector<2x8xf32>
      %cst_18 = arith.constant 0.000000e+00 : f32
      %19 = vector.broadcast %cst_18 : f32 to vector<2x8xf32>
      %20 = arith.maximumf %18, %19 : vector<2x8xf32>
      %cst_19 = arith.constant dense<0.000000e+00> : vector<2x32xf32>
      %21 = tpu.matmul %20, %17, %cst_19 {dimension_numbers = #tpu.dot_dimension_numbers<[1], [0], [0], [1], [0, 0, 1, 1], [], []>} : vector<2x8xf32>, vector<8x32xf32>, vector<2x32xf32> -> vector<2x32xf32>
      %cst_20 = arith.constant dense<0.000000e+00> : vector<2x8xf32>
      %22 = tpu.matmul %15, %16, %cst_20 {dimension_numbers = #tpu.dot_dimension_numbers<[1], [0], [0], [1], [0, 0, 1, 1], [], []>} : vector<2x32xf32>, vector<32x8xf32>, vector<2x8xf32> -> vector<2x8xf32>
      %cst_21 = arith.constant 0.000000e+00 : f32
      %23 = vector.broadcast %cst_21 : f32 to vector<2x8xf32>
      %24 = arith.maximumf %22, %23 : vector<2x8xf32>
      %cst_22 = arith.constant dense<0.000000e+00> : vector<2x32xf32>
      %25 = tpu.matmul %24, %17, %cst_22 {dimension_numbers = #tpu.dot_dimension_numbers<[1], [0], [0], [1], [0, 0, 1, 1], [], []>} : vector<2x8xf32>, vector<8x32xf32>, vector<2x32xf32> -> vector<2x32xf32>
      %26 = arith.addf %21, %25 : vector<2x32xf32>
      %27 = arith.negf %26 : vector<2x32xf32>
      %28 = math.exp %27 : vector<2x32xf32>
      %cst_23 = arith.constant 1.000000e+00 : f32
      %29 = vector.broadcast %cst_23 : f32 to vector<2x32xf32>
      %30 = arith.addf %29, %28 : vector<2x32xf32>
      %31 = arith.divf %29, %30 : vector<2x32xf32>
      %c0_24 = arith.constant 0 : index
      %c0_25 = arith.constant 0 : index
      %32 = vector.load %arg5[%c0_24, %c0_25] : memref<2x32xf32, #tpu.memory_space<vmem>>, vector<2x32xf32>
      tpu.vector_store %arg5[%c0_24, %c0_25], %31 {strides = array<i32>} : memref<2x32xf32, #tpu.memory_space<vmem>>, vector<2x32xf32>,
    } else {
    }
    return
  }
  func.func @transform_0(%arg0: i32, %arg1: i32) -> (i32, i32, i32) {
    %c0_i32 = arith.constant 0 : i32
    %c0_i32_0 = arith.constant 0 : i32
    return %arg0, %c0_i32, %arg1 : i32, i32, i32
  }
  func.func @transform_1(%arg0: i32, %arg1: i32) -> (i32, i32) {
    %c0_i32 = arith.constant 0 : i32
    %c0_i32_0 = arith.constant 0 : i32
    %c0_i32_1 = arith.constant 0 : i32
    return %c0_i32, %c0_i32_0 : i32, i32
  }
  func.func @transform_2(%arg0: i32, %arg1: i32) -> (i32, i32) {
    %c0_i32 = arith.constant 0 : i32
    %c0_i32_0 = arith.constant 0 : i32
    %c0_i32_1 = arith.constant 0 : i32
    return %c0_i32, %c0_i32_0 : i32, i32
  }
  func.func @transform_3(%arg0: i32, %arg1: i32) -> (i32, i32) {
    %c0_i32 = arith.constant 0 : i32
    %c0_i32_0 = arith.constant 0 : i32
    return %arg0, %c0_i32 : i32, i32
  }
}

</mosaic_0001>

<bundles_post_ra>
// kernel: tpu_custom_call.1
= control target key start
LH: loop header
LB: loop body
LE: loop exit
PB: predicated region body
PF: predicated region fallthrough
CT: control target
= control target key end

     0   :  { %vm23_vm0 = vcmask 130048   ;;  %s843_s0 = inlined_call_operand.vmem [shape: f32[2,32,16], index: 0, kind: input, shape index: {}]   ;;  %s844_s1 = inlined_call_operand.vmem [shape: f32[32,8], index: 1, kind: input, shape index: {}]   ;;  %s845_s2 = inlined_call_operand.vmem [shape: f32[8,32], index: 2, kind: input, shape index: {}]   ;;  %s846_s3 = inlined_call_operand.hbm [shape: f32[2,32], index: 3, kind: output, shape index: {}]  }
   0x1   :  { %v19_v0 = vld [vmem:[%s843_s0 + $0x20] sm:$0xff]  ;;  %v20_v2 = vld [vmem:[%s843_s0 + $0x28] sm:$0xff] }
   0x2   :  { %v15_v1 = vld [vmem:[%s843_s0] sm:$0xff]  ;;  %v60_v3 = vsel %vm23_vm0, %v19_v0, 0.0  ;;  %v16_v5 = vld [vmem:[%s843_s0 + $0x8] sm:$0xff]  ;;  %v63_v6 = vsel %vm23_vm0, %v20_v2, 0.0 }
   0x3   :  { %v48_v4 = vsel %vm23_vm0, %v15_v1, 0.0  ;;  %61 = vadd.xlane.f32.xlu1 %v60_v3  ;;  %v51_v7 = vsel %vm23_vm0, %v16_v5, 0.0 }
   0x4   :  { %49 = vadd.xlane.f32.xlu0 %v48_v4 }
   0x5   :  { %8 = vsyncpa [#allocation5], 0  ;;  %v21_v8 = vld [vmem:[%s843_s0 + $0x30] sm:$0xff]  ;;  %v27_v12 = vsel %vm23_vm0, %v16_v5, -inf  ;;  %v24_v13 = vsel %vm23_vm0, %v15_v1, -inf  ;;  %v39_v14 = vsel %vm23_vm0, %v20_v2, -inf  ;;  %v84_v34 = vlaneseq }
   0x6   :  { %v17_v9 = vld [vmem:[%s843_s0 + $0x10] sm:$0xff]  ;;  %v66_v10 = vsel %vm23_vm0, %v21_v8, 0.0  ;;  %v36_v15 = vsel %vm23_vm0, %v19_v0, -inf  ;;  %v22_v16 = vld [vmem:[%s843_s0 + $0x38] sm:$0xff]  ;;  %v42_v20 = vsel %vm23_vm0, %v21_v8, -inf  ;;  %v306_v24 = vld [vmem:[%s844_s1] sm:$0xff] }
   0x7   :  { %64 = vadd.xlane.f32.xlu1 %v63_v6  ;;  %v54_v11 = vsel %vm23_vm0, %v17_v9, 0.0  ;;  %v18_v17 = vld [vmem:[%s843_s0 + $0x18] sm:$0xff]  ;;  %v69_v18 = vsel %vm23_vm0, %v22_v16, 0.0  ;;  %v30_v21 = vsel %vm23_vm0, %v17_v9, -inf  ;;  %v45_v22 = vsel %vm23_vm0, %v22_v16, -inf  ;;  %v307_v25 = vld [vmem:[%s844_s1 + $0x8] sm:$0xff] }
   0x8   :  { %52 = vadd.xlane.f32.xlu0 %v51_v7  ;;  %v57_v19 = vsel %vm23_vm0, %v18_v17, 0.0  ;;  %v33_v23 = vsel %vm23_vm0, %v18_v17, -inf  ;;  %v681_v26 = vpack.c.bf16 %v307_v25, %v306_v24  ;;  %v725_v27 = vmov 0.0|0.0   ;;  %v308_v28 = vld [vmem:[%s844_s1 + $0x10] sm:$0xff]  ;;  %v309_v29 = vld [vmem:[%s844_s1 + $0x18] sm:$0xff] }
   0x9   :  { %686 = vmatprep.subr.bf16.mxu1 %v725_v27  ;;  %680 = vmatprep.subr.bf16.mxu0 %v725_v27  ;;  %v684_v30 = vpack.c.bf16 %v309_v29, %v308_v28  ;;  %vm726_vm1 = vmmov 0   ;;  %v727_v31 = vmov 0.0   ;;  %v85_v37 = vand.u32 127, %v84_v34 }
   0xa   :  { %688 = vmatpush3.bf16.msra.mxu1 %v681_v26  ;;  %682 = vmatpush3.bf16.msra.mxu0 %v681_v26  ;;  %v87_v42 = vshrl.u32 %v84_v34, 7  ;;  %vm95_vm2 = vcmask 130112   ;;  %vm102_vm3 = vcmask 195712   ;;  %vm109_vm4 = vcmask 261312  }
   0xb   :  { %67 = vadd.xlane.f32.xlu1 %v66_v10  ;;  %689 = vmatprep.subr.bf16.mxu1 %v725_v27  ;;  %v90_v40 = vadd.s32 4294967288, %v85_v37  ;;  %v97_v41 = vadd.s32 4294967280, %v85_v37  ;;  %v104_v46 = vadd.s32 4294967272, %v85_v37  ;;  %vm130_vm5 = vcmask 1041409  }
   0xc   :  { %55 = vadd.xlane.f32.xlu0 %v54_v11  ;;  %683 = vmatprep.subr.bf16.mxu0 %v725_v27  ;;  %v88_v48 = vsub.s32 %v85_v37, %v87_v42  ;;  %vm133_vm6 = vcmask 254976   ;;  %vm311_vm7 = vcmask 261120   ;;  %v310_v27 = vld [vmem:[%s845_s2] sm:$0xff]  ;;  %vm460_vm8 = vcmask 64512   ;;  %s728_s2 = smov [#allocation4]  }
   0xd   :  { %667 = vmatprep.mubr.msk.f32.mxu1 %vm726_vm1, %v727_v31  ;;  %656 = vmatprep.mubr.msk.f32.mxu0 %vm726_vm1, %v727_v31  ;;  %v93_v45 = vsub.s32 %v90_v40, %v87_v42  ;;  %v100_v47 = vsub.s32 %v97_v41, %v87_v42  ;;  %v107_v53 = vsub.s32 %v104_v46, %v87_v42  ;;  %s621_s9 = sshll.u32 %s728_s2, 4  ;;  %s622_s9 = int_to_ptr.vmem [resolvable:$true] %s621_s9 }
   0xe   :  { %691 = vmatpush3.bf16.msra.mxu1 %v684_v30  ;;  %685 = vmatpush3.bf16.msra.mxu0 %v684_v30  ;;  %s701_s10 = scalar_lea.vmem %s622_s9, 32  ;;  %p706_p1 = scmp.lt.s32.totalorder %s622_s9, %s622_s9 }
   0xf   :  { %28 = vmax.xlane.f32.xlu1 %v27_v12  ;;  %670 = vmatprep.subr.mxu1 %v727_v31  ;;  %p702_p0 = scmp.ne.s32.totalorder %s622_s9, %s701_s10  ;;  %p707_p2 = scmp.lt.s32.totalorder %s701_s10, %s701_s10 }
  0x10   :  { %25 = vmax.xlane.f32.xlu0 %v24_v13  ;;  %675 = vmatprep.subr.mxu0 %v727_v31 }
  0x11   :  { %p708_p3 = por %p707_p2, %p706_p1 }
  0x13   :  { %40 = vmax.xlane.f32.xlu1 %v39_v14  ;;  %p709_p4 = pnand %p708_p3, %p702_p0 }
  0x14   :  { %37 = vmax.xlane.f32.xlu0 %v36_v15 }
  0x17   :  { %70 = vadd.xlane.f32.xlu1 %v69_v18 }
  0x18   :  { %58 = vadd.xlane.f32.xlu0 %v57_v19 }
  0x1b   :  { %43 = vmax.xlane.f32.xlu1 %v42_v20 }
  0x1c   :  { %31 = vmax.xlane.f32.xlu0 %v30_v21 }
  0x1f   :  { %46 = vmax.xlane.f32.xlu1 %v45_v22 }
  0x20   :  { %34 = vmax.xlane.f32.xlu0 %v33_v23 }
  0x90   :  { %v62_v32 = vpop.xlane.xlu1 %61 }
  0x91   :  { %v50_v33 = vpop.xlane.xlu0 %49  ;;  %v165_v56 = vrot.slane %v62_v32, %v88_v48 }
  0x92   :  { %v146_v57 = vrot.slane %v50_v33, %v88_v48 }
  0x94   :  { %v65_v35 = vpop.xlane.xlu1 %64 }
  0x95   :  { %v53_v36 = vpop.xlane.xlu0 %52  ;;  %v169_v51 = vrot.slane %v65_v35, %v93_v45 }
  0x96   :  { %v150_v52 = vrot.slane %v53_v36, %v93_v45 }
  0x97   :  { %v170_v60 = vsel %vm95_vm2, %v169_v51, %v165_v56 }
  0x98   :  { %v68_v38 = vpop.xlane.xlu1 %67  ;;  %v151_v61 = vsel %vm95_vm2, %v150_v52, %v146_v57 }
  0x99   :  { %v56_v39 = vpop.xlane.xlu0 %55  ;;  %v174_v54 = vrot.slane %v68_v38, %v100_v47 }
  0x9a   :  { %v155_v55 = vrot.slane %v56_v39, %v100_v47 }
  0x9b   :  { %v175_v0 = vsel %vm102_vm3, %v174_v54, %v170_v60 }
  0x9c   :  { %v29_v43 = vpop.xlane.xlu1 %28  ;;  %v156_v1 = vsel %vm102_vm3, %v155_v55, %v151_v61 }
  0x9d   :  { %v26_v44 = vpop.xlane.xlu0 %25  ;;  %v94_v7 = vrot.slane %v29_v43, %v93_v45 }
  0x9e   :  { %v89_v8 = vrot.slane %v26_v44, %v88_v48 }
  0xa0   :  { %v41_v49 = vpop.xlane.xlu1 %40  ;;  %v96_v15 = vsel %vm95_vm2, %v94_v7, %v89_v8 }
  0xa1   :  { %v38_v50 = vpop.xlane.xlu0 %37  ;;  %v118_v9 = vrot.slane %v41_v49, %v93_v45 }
  0xa2   :  { %v114_v10 = vrot.slane %v38_v50, %v88_v48 }
  0xa4   :  { %v71_v58 = vpop.xlane.xlu1 %70  ;;  %v119_v16 = vsel %vm95_vm2, %v118_v9, %v114_v10 }
  0xa5   :  { %v59_v59 = vpop.xlane.xlu0 %58  ;;  %v179_v62 = vrot.slane %v71_v58, %v107_v53 }
  0xa6   :  { %v160_v63 = vrot.slane %v59_v59, %v107_v53 }
  0xa7   :  { %v180_v2 = vsel %vm109_vm4, %v179_v62, %v175_v0 }
  0xa8   :  { %v161_v3 = vsel %vm109_vm4, %v160_v63, %v156_v1  ;;  %v44_v5 = vpop.xlane.xlu1 %43 }
  0xa9   :  { %v181_v4 = vsel %vm130_vm5, %v180_v2, %v161_v3  ;;  %v32_v6 = vpop.xlane.xlu0 %31  ;;  %v123_v11 = vrot.slane %v44_v5, %v100_v47 }
  0xaa   :  { %183 = vst.msk [vmem:[#allocation3] sm:$0x3] %vm133_vm6, %v181_v4  ;;  %v101_v12 = vrot.slane %v32_v6, %v100_v47 }
  0xab   :  { %v124_v19 = vsel %vm102_vm3, %v123_v11, %v119_v16 }
  0xac   :  { %v47_v13 = vpop.xlane.xlu1 %46  ;;  %v103_v20 = vsel %vm102_vm3, %v101_v12, %v96_v15 }
  0xad   :  { %v35_v14 = vpop.xlane.xlu0 %34  ;;  %v128_v17 = vrot.slane %v47_v13, %v107_v53 }
  0xae   :  { %v108_v18 = vrot.slane %v35_v14, %v107_v53 }
  0xaf   :  { %v129_v21 = vsel %vm109_vm4, %v128_v17, %v124_v19 }
  0xb0   :  { %v110_v22 = vsel %vm109_vm4, %v108_v18, %v103_v20 }
  0xb1   :  { %v131_v23 = vsel %vm130_vm5, %v129_v21, %v110_v22  ;;  %v304_v24 = vld [vmem:[#allocation3] sm:$0x3] }
  0xb2   :  { %134 = vst.msk [vmem:[#allocation2] sm:$0x3] %vm133_vm6, %v131_v23  ;;  %v305_v25 = vmul.f32 0.0625, %v304_v24 }
  0xb4   :  { %668 = vmatmul.mubr.msk.f32.vlgmr.msra.gmra.mrb[0].mxu1 %vm311_vm7, %v305_v25 }
  0xb5   :  { %672 = vmatprep.mubr.msk.f32.mxu1 %vm726_vm1, %v727_v31  ;;  %671 = vmatpush3.msra.mxu1 %v310_v27 }
  0xb9   :  { %v303_v26 = vld [vmem:[#allocation2] sm:$0x3] }
  0xba   :  { %657 = vmatmul.mubr.msk.f32.vlgmr.msra.gmra.mrb[0].mxu0 %vm311_vm7, %v303_v26 }
  0xbb   :  { %677 = vmatprep.mubr.msk.f32.mxu0 %vm726_vm1, %v727_v31  ;;  %676 = vmatpush3.msra.mxu0 %v310_v27 }
 0x187   :  { %v455_v28 = vpop.f32.mrb[0].mxu1 }
 0x188   :  { %v459_v29 = vmax.f32 %v455_v28, 0.0  ;;  %v669_v30 = vpop.f32.mrb[1].mxu1 }
 0x18a   :  { %673 = vmatmul.mubr.msk.f32.vlgmr.msra.gmra.mrb[2].mxu1 %vm460_vm8, %v459_v29 }
 0x18d   :  { %v381_v32 = vpop.f32.mrb[0].mxu0 }
 0x18e   :  { %v385_v33 = vmax.f32 %v381_v32, 0.0  ;;  %v658_v34 = vpop.f32.mrb[1].mxu0 }
 0x190   :  { %678 = vmatmul.mubr.msk.f32.vlgmr.msra.gmra.mrb[2].mxu0 %vm460_vm8, %v385_v33 }
 0x25d   :  { %v530_v35 = vpop.f32.mrb[2].mxu1 }
 0x25e   :  { %v674_v36 = vpop.f32.mrb[3].mxu1 }
 0x263   :  { %v603_v37 = vpop.f32.mrb[2].mxu0 }
 0x264   :  { %v604_v38 = vadd.f32 %v603_v37, %v530_v35  ;;  %v679_v31 = vpop.f32.mrb[3].mxu0 }
 0x266   :  { %v633_v39 = vmul.f32 -1.442695, %v604_v38 }
 0x268   :  { %697 = vpow2.f32 %v633_v39 }
 0x272   :  { %v698_v40 = vpop.eup %697 }
 0x273   :  { %v610_v41 = vadd.f32 1.0, %v698_v40 }
 0x275   :  { %699 = vrcp.f32 %v610_v41 }
 0x27f   :  { %v700_v42 = vpop.eup %699 }
 0x280   :  { %614 = vst.msk [vmem:[#allocation4] sm:$0x3] %vm133_vm6, %v700_v42 }
 0x281   :  { %712 = shalt.err (!%p709_p4)
}
 0x282   :  { %s713_s13 = scalar_lea.hbm %s846_s3, 32 }
 0x283   :  { %p714_p5 = scmp.ne.s32.totalorder %s846_s3, %s713_s13  ;;  %p717_p6 = scmp.lt.u32.totalorder %s713_s13, %s846_s3 }
 0x285   :  { %p719_p7 = pnand %p717_p6, %p714_p5 }
 0x287   :  { %722 = shalt.err (!%p719_p7)
}
 0x288   :  { %624 = dma.vmem_to_hbm [thread:$0]  %s622_s9, 32, %s846_s3, [#allocation5]  }
 0x289   :  { %723 = dma.done.wait [#allocation5], 32  }
 0x28a   :  { %724 = vsyncadd [#allocation5], 4294967264 }
 0x28b   :  { %628 = vsyncpa [#allocation5], 1 }

</bundles_post_ra>
